<compile_context>
chip_gen: v7x
topology: tpu7x:2x2x1
jax: 0.10.0
libtpu: 0.0.40
codegen_flags: <defaults>
</compile_context>

<pallas_src>
import functools

import jax
import jax.numpy as jnp
from jax.experimental import pallas as pl
from jax.experimental.pallas import tpu as pltpu


# --------------------------------------------------------------------------- #
# Helpers
# --------------------------------------------------------------------------- #
def _vmem_capacity_bytes():
    """Physical VMEM of the current generation; conservative fallback."""
    try:
        return int(pltpu.get_tpu_info().vmem_capacity_bytes)
    except Exception:
        return 64 * 2**20  # v7x per-TensorCore capacity (safe everywhere)


def _divisors(n):
    ds = set()
    i = 1
    while i * i <= n:
        if n % i == 0:
            ds.add(i)
            ds.add(n // i)
        i += 1
    return sorted(ds)


# --------------------------------------------------------------------------- #
# Kernels
# --------------------------------------------------------------------------- #
def _fused_kernel(x_ref, w1t_ref, b1_ref, w2t_ref, b2_ref, o_ref, *, inv_l):
    """Pool -> MLP -> sigmoid -> gate, all on one resident (tile_b, C, L) slab."""
    x = x_ref[...]                                                  # (tb, C, L)
    pooled = jnp.sum(x.astype(jnp.float32), axis=-1) * inv_l        # (tb, C) f32
    h = jnp.dot(pooled, w1t_ref[...],
                preferred_element_type=jnp.float32) + b1_ref[...]
    h = jnp.maximum(h, 0.0)
    z = jnp.dot(h, w2t_ref[...],
                preferred_element_type=jnp.float32) + b2_ref[...]
    s = (1.0 / (1.0 + jnp.exp(-z))).astype(x.dtype)                 # (tb, C)
    o_ref[...] = x * s[:, :, None]


def _pool_kernel(x_ref, pooled_ref, acc_ref, *, inv_l):
    """f32-accumulated channel means; grid = (batch tiles, L tiles)."""
    li = pl.program_id(1)

    @pl.when(li == 0)
    def _():
        acc_ref[...] = jnp.zeros_like(acc_ref)

    acc_ref[...] += jnp.sum(x_ref[...].astype(jnp.float32), axis=-1)

    @pl.when(li == pl.num_programs(1) - 1)
    def _():
        pooled_ref[...] = (acc_ref[...] * inv_l)[:, None, :]        # (tb, 1, C)


def _scale_kernel(x_ref, s_ref, o_ref):
    """(tile_b, C, tile_l) * (tile_b, C, 1) lane-broadcast multiply."""
    o_ref[...] = x_ref[...] * s_ref[...]


# --------------------------------------------------------------------------- #
# Wrapper
# --------------------------------------------------------------------------- #
def squeeze_and_excitation(x, w1, b1, w2, b2, *, donate_x=False,
                           fused_slab_cap_bytes=None, stream_block_bytes=None):
    B, C, L = x.shape
    # dense1 -> dense2 -> elementwise mul is only shape-consistent when
    # in_features == out_features == C (as in the original module's usage).
    assert w1.shape == (C, C) and w2.shape == (C, C), (
        "SqueezeAndExcitationBlock requires in_features == out_features == C")
    assert b1.shape == (C,) and b2.shape == (C,)

    itemsize = x.dtype.itemsize
    vmem_cap = _vmem_capacity_bytes()
    ceiling = max(24 * 2**20, vmem_cap - 16 * 2**20)  # scoped-VMEM request cap
    inv_l = 1.0 / float(L)
    alias = {0: 0} if donate_x else {}

    # Resident f32 transposed weights + biases (double-buffered) for Path A.
    weight_bytes = 2 * (2 * C * C * 4 + 2 * C * 4)
    row_bytes = C * L * itemsize                      # one (C, L) slab, x dtype
    # Per slab element: 2x in + 2x out (double buffers) + one f32 pooling temp.
    per_elem = 4 * itemsize + 4
    if fused_slab_cap_bytes is None:
        budget = max(0, (3 * ceiling) // 4 - weight_bytes)
        fused_slab_cap_bytes = budget * itemsize // per_elem

    # ---------------- Path A: fused single pass (~2x|x| HBM traffic) --------
    if 0 < row_bytes <= fused_slab_cap_bytes:
        fits = [d for d in _divisors(B) if d * row_bytes <= fused_slab_cap_bytes]
        smaller = [d for d in fits if d < B]
        tile_b = max(smaller) if smaller else max(fits)  # keep >=2 steps when B>1
        grid_b = B // tile_b
        vmem_req = tile_b * C * L * per_elem + weight_bytes + (2 << 20)
        return pl.pallas_call(
            functools.partial(_fused_kernel, inv_l=inv_l),
            out_shape=jax.ShapeDtypeStruct((B, C, L), x.dtype),
            grid=(grid_b,),
            in_specs=[
                pl.BlockSpec((tile_b, C, L), lambda b: (b, 0, 0)),
                pl.BlockSpec((C, C), lambda b: (0, 0)),
                pl.BlockSpec((1, C), lambda b: (0, 0)),
                pl.BlockSpec((C, C), lambda b: (0, 0)),
                pl.BlockSpec((1, C), lambda b: (0, 0)),
            ],
            out_specs=pl.BlockSpec((tile_b, C, L), lambda b: (b, 0, 0)),
            input_output_aliases=alias,
            compiler_params=pltpu.CompilerParams(
                dimension_semantics=("parallel",),
                vmem_limit_bytes=int(min(ceiling, max(32 * 2**20, vmem_req)))),
        )(x,
          jnp.asarray(w1, jnp.float32).T,        # pre-transposed: no relayout
          jnp.asarray(b1, jnp.float32).reshape(1, C),
          jnp.asarray(w2, jnp.float32).T,
          jnp.asarray(b2, jnp.float32).reshape(1, C))

    # ---------------- Path B: two-phase streaming (large (C, L) slabs) ------
    if stream_block_bytes is None:
        stream_block_bytes = max(1 << 20, min(8 << 20, ceiling // 16))

    if L % 128 == 0:
        cands = [d for d in _divisors(L) if d % 128 == 0]
        fits_l = [d for d in cands if C * d * itemsize <= stream_block_bytes]
        tile_l = max(fits_l) if fits_l else min(cands)   # lane-dense tiles
    else:
        # TODO(synk): fold channel groups into the lane axis
        # ((B, C, L) -> (B, C//g, g*L)) for lane-dense stores when L % 128 != 0.
        tile_l = L
    n_l = L // tile_l

    blk_bytes = C * tile_l * itemsize
    fits_b = [d for d in _divisors(B) if d * blk_bytes <= stream_block_bytes]
    tile_b = max(fits_b) if fits_b else 1                # >= ~1 MiB per step
    grid_b = B // tile_b

    # Phase 1: batch-tiled, megacore-parallel global average pool (f32 acc).
    vmem_req1 = (tile_b * C * tile_l * (2 * itemsize + 4)
                 + 3 * tile_b * C * 4 + (2 << 20))
    pooled = pl.pallas_call(
        functools.partial(_pool_kernel, inv_l=inv_l),
        out_shape=jax.ShapeDtypeStruct((B, 1, C), jnp.float32),
        grid=(grid_b, n_l),
        in_specs=[pl.BlockSpec((tile_b, C, tile_l), lambda b, l: (b, 0, l))],
        out_specs=pl.BlockSpec((tile_b, 1, C), lambda b, l: (b, 0, 0)),
        scratch_shapes=[pltpu.VMEM((tile_b, C), jnp.float32)],
        compiler_params=pltpu.CompilerParams(
            dimension_semantics=("parallel", "arbitrary"),
            vmem_limit_bytes=int(min(ceiling, max(32 * 2**20, vmem_req1)))),
    )(x)

    # Tiny (B, C) MLP stays in plain XLA so W1/W2 never occupy kernel VMEM.
    pooled2 = pooled.reshape(B, C)
    h = jnp.maximum(
        pooled2 @ jnp.asarray(w1, jnp.float32).T + jnp.asarray(b1, jnp.float32),
        0.0)
    z = h @ jnp.asarray(w2, jnp.float32).T + jnp.asarray(b2, jnp.float32)
    gate = (1.0 / (1.0 + jnp.exp(-z))).astype(x.dtype).reshape(B, C, 1)

    # Phase 2: streaming, double-buffered gating multiply in the input dtype.
    vmem_req2 = (4 * tile_b * C * tile_l * itemsize
                 + 2 * tile_b * C * itemsize + (2 << 20))
    return pl.pallas_call(
        _scale_kernel,
        out_shape=jax.ShapeDtypeStruct((B, C, L), x.dtype),
        grid=(grid_b, n_l),
        in_specs=[
            pl.BlockSpec((tile_b, C, tile_l), lambda b, l: (b, 0, l)),
            pl.BlockSpec((tile_b, C, 1), lambda b, l: (b, 0, 0)),
        ],
        out_specs=pl.BlockSpec((tile_b, C, tile_l), lambda b, l: (b, 0, l)),
        input_output_aliases=alias,
        compiler_params=pltpu.CompilerParams(
            dimension_semantics=("parallel", "parallel"),
            vmem_limit_bytes=int(min(ceiling, max(32 * 2**20, vmem_req2)))),
    )(x, gate)


# --------------------------------------------------------------------------- #
# Reference + self-test
# --------------------------------------------------------------------------- #
def _reference(x, w1, b1, w2, b2):
    pooled = jnp.mean(x.astype(jnp.float32), axis=-1)
    h = jnp.maximum(pooled @ jnp.asarray(w1, jnp.float32).T
                    + jnp.asarray(b1, jnp.float32), 0.0)
    z = h @ jnp.asarray(w2, jnp.float32).T + jnp.asarray(b2, jnp.float32)
    s = 1.0 / (1.0 + jnp.exp(-z))
    return (x * s.astype(x.dtype)[:, :, None]).astype(x.dtype)


if __name__ == "__main__":
    key = jax.random.PRNGKey(0)
    kx1, kx2, kp1, kp2 = jax.random.split(key, 4)

    def make_params(k, C):
        kw1, kb1, kw2, kb2 = jax.random.split(k, 4)
        bound = 1.0 / (C ** 0.5)          # torch.nn.Linear-style init
        w1 = jax.random.uniform(kw1, (C, C), jnp.float32, -bound, bound)
        b1 = jax.random.uniform(kb1, (C,), jnp.float32, -bound, bound)
        w2 = jax.random.uniform(kw2, (C, C), jnp.float32, -bound, bound)
        b2 = jax.random.uniform(kb2, (C,), jnp.float32, -bound, bound)
        return w1, b1, w2, b2

    # Case 1: small shape -> fused single-pass path.
    B, C, L = 2, 8, 16
    x = jax.random.normal(kx1, (B, C, L), jnp.float32)
    w1, b1, w2, b2 = make_params(kp1, C)
    out = jax.block_until_ready(squeeze_and_excitation(x, w1, b1, w2, b2))
    ref = _reference(x, w1, b1, w2, b2)
    assert out.shape == (B, C, L)
    assert jnp.allclose(out, ref, atol=1e-5, rtol=1e-5), "fused path mismatch"

    # Case 2: force the two-phase streaming path (multi-step L accumulation),
    # still at small shapes, by shrinking the internal VMEM-budget thresholds.
    B, C, L = 2, 8, 512
    x = jax.random.normal(kx2, (B, C, L), jnp.float32)
    w1, b1, w2, b2 = make_params(kp2, C)
    out = jax.block_until_ready(
        squeeze_and_excitation(x, w1, b1, w2, b2,
                               fused_slab_cap_bytes=0, stream_block_bytes=8192))
    ref = _reference(x, w1, b1, w2, b2)
    assert out.shape == (B, C, L)
    assert jnp.allclose(out, ref, atol=1e-5, rtol=1e-5), "streaming path mismatch"

    print("KERNEL_OK")
</pallas_src>

<mosaic_0001>
module attributes {stable_mosaic.version = 11 : i64} {
  func.func @_fused_kernel(%arg0: i32, %arg1: memref<1x8x16xf32, #tpu.memory_space<vmem>>, %arg2: memref<8x8xf32, #tpu.memory_space<vmem>>, %arg3: memref<1x8xf32, #tpu.memory_space<vmem>>, %arg4: memref<8x8xf32, #tpu.memory_space<vmem>>, %arg5: memref<1x8xf32, #tpu.memory_space<vmem>>, %arg6: memref<1x8x16xf32, #tpu.memory_space<vmem>>) attributes {dimension_semantics = [#tpu.dimension_semantics<parallel>], iteration_bounds = array<i64: 2>, scalar_prefetch = 0 : i64, scratch_operands = 0 : i64, tpu.core_type = #tpu.core_type<tc>, window_params = [{transform_indices = @transform_0, window_bounds = array<i64: 1, 8, 16>}, {pipeline_mode = #tpu.pipeline_mode<synchronous>, transform_indices = @transform_1, window_bounds = array<i64: 8, 8>}, {pipeline_mode = #tpu.pipeline_mode<synchronous>, transform_indices = @transform_2, window_bounds = array<i64: 1, 8>}, {pipeline_mode = #tpu.pipeline_mode<synchronous>, transform_indices = @transform_3, window_bounds = array<i64: 8, 8>}, {pipeline_mode = #tpu.pipeline_mode<synchronous>, transform_indices = @transform_4, window_bounds = array<i64: 1, 8>}, {transform_indices = @transform_5, window_bounds = array<i64: 1, 8, 16>}]} {
    %c0 = arith.constant 0 : index
    %c0_0 = arith.constant 0 : index
    %c0_1 = arith.constant 0 : index
    %0 = vector.load %arg1[%c0, %c0_0, %c0_1] : memref<1x8x16xf32, #tpu.memory_space<vmem>>, vector<1x8x16xf32>
    %cst = arith.constant dense<0.000000e+00> : vector<1x8xf32>
    %1 = vector.multi_reduction <add>, %0, %cst [2] : vector<1x8x16xf32> to vector<1x8xf32>
    %cst_2 = arith.constant 6.250000e-02 : f32
    %2 = vector.broadcast %cst_2 : f32 to vector<1x8xf32>
    %3 = arith.mulf %1, %2 : vector<1x8xf32>
    %c0_3 = arith.constant 0 : index
    %c0_4 = arith.constant 0 : index
    %4 = vector.load %arg2[%c0_3, %c0_4] : memref<8x8xf32, #tpu.memory_space<vmem>>, vector<8x8xf32>
    %cst_5 = arith.constant dense<0.000000e+00> : vector<1x8xf32>
    %5 = tpu.matmul %3, %4, %cst_5 {dimension_numbers = #tpu.dot_dimension_numbers<[1], [0], [0], [1], [0, 0, 1, 1], [], []>} : vector<1x8xf32>, vector<8x8xf32>, vector<1x8xf32> -> vector<1x8xf32>
    %c0_6 = arith.constant 0 : index
    %c0_7 = arith.constant 0 : index
    %6 = vector.load %arg3[%c0_6, %c0_7] : memref<1x8xf32, #tpu.memory_space<vmem>>, vector<1x8xf32>
    %7 = arith.addf %5, %6 : vector<1x8xf32>
    %cst_8 = arith.constant 0.000000e+00 : f32
    %8 = vector.broadcast %cst_8 : f32 to vector<1x8xf32>
    %9 = arith.maximumf %7, %8 : vector<1x8xf32>
    %c0_9 = arith.constant 0 : index
    %c0_10 = arith.constant 0 : index
    %10 = vector.load %arg4[%c0_9, %c0_10] : memref<8x8xf32, #tpu.memory_space<vmem>>, vector<8x8xf32>
    %cst_11 = arith.constant dense<0.000000e+00> : vector<1x8xf32>
    %11 = tpu.matmul %9, %10, %cst_11 {dimension_numbers = #tpu.dot_dimension_numbers<[1], [0], [0], [1], [0, 0, 1, 1], [], []>} : vector<1x8xf32>, vector<8x8xf32>, vector<1x8xf32> -> vector<1x8xf32>
    %c0_12 = arith.constant 0 : index
    %c0_13 = arith.constant 0 : index
    %12 = vector.load %arg5[%c0_12, %c0_13] : memref<1x8xf32, #tpu.memory_space<vmem>>, vector<1x8xf32>
    %13 = arith.addf %11, %12 : vector<1x8xf32>
    %cst_14 = arith.constant 0.000000e+00 : f32
    %14 = vector.broadcast %cst_14 : f32 to vector<1x8xf32>
    %15 = arith.subf %14, %13 : vector<1x8xf32>
    %16 = math.exp %15 : vector<1x8xf32>
    %cst_15 = arith.constant 1.000000e+00 : f32
    %17 = vector.broadcast %cst_15 : f32 to vector<1x8xf32>
    %18 = arith.addf %17, %16 : vector<1x8xf32>
    %cst_16 = arith.constant 1.000000e+00 : f32
    %19 = vector.broadcast %cst_16 : f32 to vector<1x8xf32>
    %20 = arith.divf %19, %18 : vector<1x8xf32>
    %21 = vector.shape_cast %20 : vector<1x8xf32> to vector<1x8x1xf32>
    %22 = vector.broadcast %21 : vector<1x8x1xf32> to vector<1x8x16xf32>
    %23 = arith.mulf %0, %22 : vector<1x8x16xf32>
    %c0_17 = arith.constant 0 : index
    %c0_18 = arith.constant 0 : index
    %c0_19 = arith.constant 0 : index
    %24 = vector.load %arg6[%c0_17, %c0_18, %c0_19] : memref<1x8x16xf32, #tpu.memory_space<vmem>>, vector<1x8x16xf32>
    tpu.vector_store %arg6[%c0_17, %c0_18, %c0_19], %23 {strides = array<i32>} : memref<1x8x16xf32, #tpu.memory_space<vmem>>, vector<1x8x16xf32>,
    return
  }
  func.func @transform_0(%arg0: i32) -> (i32, i32, i32) {
    %c0_i32 = arith.constant 0 : i32
    %c0_i32_0 = arith.constant 0 : i32
    %c0_i32_1 = arith.constant 0 : i32
    return %arg0, %c0_i32, %c0_i32_0 : i32, i32, i32
  }
  func.func @transform_1(%arg0: i32) -> (i32, i32) {
    %c0_i32 = arith.constant 0 : i32
    %c0_i32_0 = arith.constant 0 : i32
    %c0_i32_1 = arith.constant 0 : i32
    return %c0_i32, %c0_i32_0 : i32, i32
  }
  func.func @transform_2(%arg0: i32) -> (i32, i32) {
    %c0_i32 = arith.constant 0 : i32
    %c0_i32_0 = arith.constant 0 : i32
    %c0_i32_1 = arith.constant 0 : i32
    return %c0_i32, %c0_i32_0 : i32, i32
  }
  func.func @transform_3(%arg0: i32) -> (i32, i32) {
    %c0_i32 = arith.constant 0 : i32
    %c0_i32_0 = arith.constant 0 : i32
    %c0_i32_1 = arith.constant 0 : i32
    return %c0_i32, %c0_i32_0 : i32, i32
  }
  func.func @transform_4(%arg0: i32) -> (i32, i32) {
    %c0_i32 = arith.constant 0 : i32
    %c0_i32_0 = arith.constant 0 : i32
    %c0_i32_1 = arith.constant 0 : i32
    return %c0_i32, %c0_i32_0 : i32, i32
  }
  func.func @transform_5(%arg0: i32) -> (i32, i32, i32) {
    %c0_i32 = arith.constant 0 : i32
    %c0_i32_0 = arith.constant 0 : i32
    %c0_i32_1 = arith.constant 0 : i32
    return %arg0, %c0_i32, %c0_i32_0 : i32, i32, i32
  }
}

</mosaic_0001>

<bundles_post_ra>
// kernel: tpu_custom_call.1
= control target key start
LH: loop header
LB: loop body
LE: loop exit
PB: predicated region body
PF: predicated region fallthrough
CT: control target
= control target key end

     0   :  { %10 = vsyncpa [#allocation3], 0  ;;  %s1000_s0 = inlined_call_operand.hbm [shape: f32[2,8,16], index: 0, kind: input, shape index: {}]   ;;  %s1001_s1 = inlined_call_operand.hbm [shape: f32[8,8], index: 1, kind: input, shape index: {}]   ;;  %s1002_s2 = inlined_call_operand.vmem [shape: f32[1,8], index: 2, kind: input, shape index: {}]   ;;  %s1003_s3 = inlined_call_operand.vmem [shape: f32[8,8], index: 3, kind: input, shape index: {}]   ;;  %s1004_s4 = inlined_call_operand.vmem [shape: f32[1,8], index: 4, kind: input, shape index: {}]   ;;  %s1005_s5 = inlined_call_operand.hbm [shape: f32[2,8,16], index: 5, kind: output, shape index: {}]  }
   0x1   :  { %12 = vsyncpa [#allocation3 + $0x1], 0 }
   0x2   :  { %13 = vsyncpa [#allocation6], 0 }
   0x3   :  { %14 = vsyncpa [#allocation4], 0 }
   0x4   :  { %16 = vsyncpa [#allocation4 + $0x1], 0  ;;  %s784_s18 = smov 0   ;;  %s786_s19 = smov 0  }
   0x5   :  { %s788_s20 = smov 0   ;;  %s790_s21 = smov 0  }
   0x6 LB: > { %s805_s22 = sadd.s32 4294967295, %s747_s21   ;;  %s526_s23 = sadd.s32 4294967294, %s747_s21   ;;  %s747_s21 = sphi %s790_s21, %s1029_s21   ;;  %s743_s20 = sphi %s788_s20, %s1028_s20   ;;  %s739_s19 = sphi %s786_s19, %s1027_s19   ;;  %s735_s18 = sphi %s784_s18, %s1026_s18  }
   0x7   : > { %p42_p0 = scmp.ne.s32.totalorder %s739_s19, %s735_s18  ;;  %p1006_p1 = scmp.eq.s32.totalorder %s805_s22, 0 }
   0x8   : > { %p156_p3 = scmp.eq.s32.totalorder %s526_s23, 1  ;;  %p527_p5 = scmp.ge.s32.totalorder %s747_s21, 1 }
   0x9   : > { %p814_p4 = por %p1006_p1, %p42_p0  ;;  %p163_p7 = scmp.lt.s32.totalorder %s747_s21, 3 }
   0xa   : > { %p819_p6 = por %p156_p3, %p42_p0  ;;  %s749_s27 = smov [#allocation5]  }
   0xb   : > { %s1009_s24 = scalar_select %p814_p4, 1, 0 }
   0xc   : > { %s1010_s25 = scalar_select %p819_p6, 1, 0 }
   0xd   : > { %p824_p8 = pnand %p527_p5, %p163_p7  ;;  %s176_s28 = sshll.u32 %s749_s27, 4  ;;  %s177_s28 = int_to_ptr.vmem [resolvable:$true] %s176_s28 }
   0xe   : > { %s832_s29 = sadd.s32 1, %s747_s21   ;;  %s29_s8 = sadd.s32 1, %s743_s20 }
   0xf   : > { %s1011_s26 = scalar_select %p824_p8, 1, 0 }
  0x10   : > { %p564_p10 = pneg %p824_p8  ;;  %s26_s6 = ssub.s32 %s747_s21, %s832_s29 }
  0x11   : > { %p842_p12 = scmp.eq.s32.totalorder %s26_s6, 0  ;;  %s619_s11 = scalar_lea.hbm %s1001_s1, 128 }
  0x12   : > { %p836_p11 = pnand %p564_p10, %p1006_p1  ;;  %p620_p0 = scmp.ne.s32.totalorder %s1001_s1, %s619_s11 }
  0x13   : > { %s1013_s7 = scalar_select %p842_p12, 1, 0 }
  0x14   : > { %p621_p3 = pneg %p836_p11  ;;  %p626_p10 = scmp.lt.u32.totalorder %s619_s11, %s1001_s1 }
  0x16   : > { %p622_p5 = pnand %p621_p3, %p620_p0 }
  0x18   : > { %p623_p7 = pneg %p622_p5 }
  0x1a   : > { %p628_p9 = pnand %p626_p10, %p623_p7 }
  0x1c   : > { %631 = shalt.err (!%p628_p9)
}
  0x1d   : > { %s632_s16 = scalar_lea.vmem %s177_s28, 128  ;;  %p640_p6 = scmp.lt.s32.totalorder %s177_s28, %s177_s28 }
  0x1e   : > { %p633_p1 = scmp.ne.s32.totalorder %s177_s28, %s632_s16  ;;  %p641_p4 = scmp.lt.s32.totalorder %s632_s16, %s632_s16 }
  0x20   : > { %p635_p2 = pnand %p633_p1, %p621_p3  ;;  %p642_p8 = por %p641_p4, %p640_p6 }
  0x22   : > { %p636_p13 = pneg %p635_p2 }
  0x24   : > { %p643_p12 = pnand %p642_p8, %p636_p13 }
  0x26   : > { %646 = shalt.err (!%p643_p12)
}
  0x27   : > { %567 = dma.hbm_to_vmem [thread:$0]  (!%p836_p11), %s1001_s1, 128, %s177_s28, [#allocation6]  }
  0x28   : > { %p1014_p1 = scmp.ne.s32.totalorder %s1013_s7, 0  ;;  %p37_p2 = scmp.eq.s32.totalorder %s747_s21, 0 }
  0x29   : > { %p1015_p4 = scmp.ne.s32.totalorder %s743_s20, %s739_s19  ;;  %p1016_p6 = scmp.eq.s32.totalorder %s805_s22, 1 }
  0x2a   : > { %s868_s27 = scalar_select %p1014_p1, %s743_s20, %s29_s8  }
  0x2b   : > { %p876_p8 = por %p1016_p6, %p1015_p4  ;;  %p577_p9 = scmp.lt.s32.totalorder %s747_s21, 2 }
  0x2c   : > { %s196_s6 = sand.u32 1, %s743_s20   ;;  %p1018_p12 = pmov %p1015_p4 }
  0x2d   : > { %s530_s9 = sshll.u32 %s196_s6, 3  ;;  %s531_s10 = sshll.u32 %s747_s21, 7 }
  0x2e   : > { %p38_p13 = por %p37_p2, %p1018_p12  ;;  %s889_s28 = scalar_lea.hbm %s1000_s0, %s531_s10 }
  0x2f   : > { %s200_s7 = scalar_lea.vmem [#allocation2], %s530_s9  ;;  %s197_s14 = scalar_lea.sflag [#allocation3], %s196_s6 }
  0x30   : > { %s207_s8 = sshll.u32 %s200_s7, 4  ;;  %p891_p11 = pnand %p577_p9, %p38_p13  ;;  %s895_s8 = int_to_ptr.vmem [resolvable:$true] %s207_s8 }
  0x31   : > { %s647_s15 = scalar_lea.hbm %s889_s28, 128  ;;  %s652_s23 = scalar_lea.hbm %s1000_s0, 256 }
  0x32   : > { %p648_p0 = scmp.ne.s32.totalorder %s889_s28, %s647_s15  ;;  %p649_p3 = pneg %p891_p11 }
  0x33   : > { %p653_p10 = scmp.lt.u32.totalorder %s889_s28, %s1000_s0  ;;  %p654_p1 = scmp.lt.u32.totalorder %s652_s23, %s647_s15 }
  0x34   : > { %p650_p5 = pnand %p649_p3, %p648_p0  ;;  %p656_p4 = scmp.lt.u32.totalorder %s647_s15, %s889_s28 }
  0x35   : > { %p655_p2 = por %p654_p1, %p653_p10 }
  0x36   : > { %p651_p7 = pneg %p650_p5 }
  0x37   : > { %p657_p6 = por %p656_p4, %p655_p2 }
  0x39   : > { %p658_p9 = pnand %p657_p6, %p651_p7 }
  0x3b   : > { %661 = shalt.err (!%p658_p9)
}
  0x3c   : > { %s662_s6 = scalar_lea.vmem %s895_s8, 128  ;;  %s750_s11 = smov [#allocation2]  }
  0x3d   : > { %p663_p12 = scmp.ne.s32.totalorder %s895_s8, %s662_s6  ;;  %s667_s12 = sshll.u32 %s750_s11, 4  ;;  %s668_s12 = int_to_ptr.vmem [resolvable:$false] %s667_s12 }
  0x3e   : > { %s669_s7 = scalar_lea.vmem %s668_s12, 256  ;;  %p670_p5 = scmp.lt.s32.totalorder %s895_s8, %s668_s12 }
  0x3f   : > { %p665_p13 = pnand %p663_p12, %p649_p3  ;;  %p671_p10 = scmp.lt.s32.totalorder %s669_s7, %s662_s6 }
  0x41   : > { %p666_p0 = pneg %p665_p13  ;;  %p672_p1 = por %p671_p10, %p670_p5 }
  0x43   : > { %p673_p2 = pnand %p672_p1, %p666_p0 }
  0x45   : > { %676 = shalt.err (!%p673_p2)
}
  0x46   : > { %571 = dma.hbm_to_vmem [thread:$0]  (!%p891_p11), %s889_s28, 128, %s895_s8, %s197_s14  }
  0x47   : > { %p1020_p7 = scmp.ne.s32.totalorder %s1011_s26, 0 }
  0x48   : > { %s925_s15 = sand.u32 (!%p1020_p7), 1, %s739_s19   ;;  %p1021_p3 = scmp.ne.s32.totalorder (!%p1020_p7), %s1009_s24, 0 }
  0x49   : > { %216 = sbr.rel (%p1020_p7) target bundleno = 823 (0x337), region = 40  ;;  %s533_s16 = sshll.u32 (!%p1020_p7), %s925_s15, 3 }
  0x4a   : > { %s219_s17 = scalar_lea.sflag (!%p1020_p7), [#allocation3], %s925_s15  ;;  %s222_s23 = scalar_lea.vmem (!%p1020_p7), [#allocation2], %s533_s16 }
  0x50   : > { %722 = dma.done.wait (%p1021_p3), %s219_s17, 128  }
  0x51   : > { %724 = vsyncadd (%p1021_p3), %s219_s17, 4294967168  ;;  %p1022_p11 = scmp.eq.s32.totalorder %s805_s22, 0 }
  0x53   : > { %726 = dma.done.wait (%p1022_p11), [#allocation6], 128   ;;  %p1023_p4 = pmov %p1022_p11 }
  0x54   : > { %vm254_vm0 = vcmask 130048   ;;  %v253_v0 = vld [vmem:[%s222_s23] sm:$0xff]  ;;  %v751_v2 = vmov 0.0   ;;  %v259_v3 = vld [vmem:[#allocation5] sm:$0xff]  ;;  %vm752_vm1 = vmmov 0   ;;  %v262_v4 = vlaneseq  ;;  %s539_s9 = sshll.u32 %s805_s22, 7 }
  0x55   : > { %728 = vsyncadd (%p1023_p4), [#allocation6], 4294967168  ;;  %v255_v1 = vsel %vm254_vm0, %v253_v0, 0.0  ;;  %546 = vmatprep.subr.mxu0 %v751_v2  ;;  %551 = vmatprep.subr.mxu1 %v751_v2  ;;  %vm268_vm2 = vcmask 64512   ;;  %v342_v11 = vld [vmem:[%s1003_s3] sm:$0xff]  ;;  %s252_s10 = scalar_lea.vmem [#allocation7], %s533_s16  ;;  %s955_s7 = scalar_lea.hbm %s1005_s5, %s539_s9 }
  0x56   : > { %256 = vadd.xlane.f32.xlu0 %v255_v1  ;;  %547 = vmatpush3.msra.mxu0 %v259_v3  ;;  %v263_v5 = vand.u32 127, %v262_v4  ;;  %v265_v6 = vshrl.u32 %v262_v4, 7  ;;  %v260_v12 = vld [vmem:[%s1002_s2] sm:$0x1]  ;;  %s446_s6 = sshll.u32 %s252_s10, 4  ;;  %s433_s17 = scalar_lea.sflag [#allocation4], %s925_s15  ;;  %s957_s6 = int_to_ptr.vmem [resolvable:$true] %s446_s6 }
  0x57   : > { %548 = vmatprep.mubr.msk.f32.mxu0 %vm752_vm1, %v751_v2  ;;  %553 = vmatprep.mubr.msk.f32.mxu1 %vm752_vm1, %v751_v2  ;;  %v343_v17 = vld [vmem:[%s1004_s4] sm:$0x1]  ;;  %s677_s23 = scalar_lea.vmem %s957_s6, 128  ;;  %s753_s22 = smov [#allocation7]  }
  0x58   : > { %v266_v7 = vsub.s32 %v263_v5, %v265_v6  ;;  %552 = vmatpush3.msra.mxu1 %v342_v11  ;;  %v425_v25 = vsub.s32 0, %v265_v6  ;;  %p678_p6 = scmp.ne.s32.totalorder %s957_s6, %s677_s23  ;;  %s681_s16 = sshll.u32 %s753_s22, 4  ;;  %s682_s16 = int_to_ptr.vmem [resolvable:$false] %s681_s16 }
  0x59   : > { %s683_s24 = scalar_lea.vmem %s682_s16, 256  ;;  %p684_p13 = scmp.lt.s32.totalorder %s957_s6, %s682_s16 }
  0x5a   : > { %p679_p9 = pnand %p678_p6, %p876_p8  ;;  %p685_p0 = scmp.lt.s32.totalorder %s683_s24, %s677_s23 }
  0x5c   : > { %p680_p12 = pneg %p679_p9  ;;  %p686_p5 = por %p685_p0, %p684_p13 }
  0x5e   : > { %p687_p10 = pnand %p686_p5, %p680_p12 }
  0xe3   : > { %v257_v8 = vpop.xlane.xlu0 %256 }
  0xe4   : > { %v258_v9 = vmul.f32 0.0625, %v257_v8 }
  0xe6   : > { %v267_v10 = vrot.slane %v258_v9, %v266_v7 }
  0xe8   : > { %549 = vmatmul.mubr.msk.f32.vlgmr.msra.gmra.mrb[0].mxu0 %vm268_vm2, %v267_v10 }
 0x1bb   : > { %v337_v13 = vpop.f32.mrb[0].mxu0 }
 0x1bc   : > { %v338_v14 = vadd.f32 %v337_v13, %v260_v12  ;;  %v550_v15 = vpop.f32.mrb[1].mxu0 }
 0x1be   : > { %v341_v16 = vmax.f32 %v338_v14, 0.0 }
 0x1c0   : > { %554 = vmatmul.mubr.msk.f32.vlgmr.msra.gmra.mrb[0].mxu1 %vm268_vm2, %v341_v16 }
 0x293   : > { %v413_v18 = vpop.f32.mrb[0].mxu1 }
 0x294   : > { %v414_v19 = vadd.f32 %v413_v18, %v343_v17  ;;  %v555_v20 = vpop.f32.mrb[1].mxu1 }
 0x296   : > { %v417_v21 = vsub.f32 0.0, %v414_v19 }
 0x298   : > { %v418_v22 = vmul.f32 1.442695, %v417_v21 }
 0x29a   : > { %615 = vpow2.f32 %v418_v22 }
 0x2a4   : > { %v616_v23 = vpop.eup %615 }
 0x2a5   : > { %v420_v24 = vadd.f32 1.0, %v616_v23 }
 0x2a7   : > { %617 = vrcp.f32 %v420_v24 }
 0x2b1   : > { %v618_v26 = vpop.eup %617 }
 0x2b2   : > { %v426_v27 = vrot.slane %v618_v26, %v425_v25 }
 0x2b4   : > { %428 = vbcast.lane.b32.xlu0 %v426_v27, 256 }
 0x326   : > { %v429_v28 = vpop.permute.xlu0 %428 }
 0x327   : > { %v430_v29 = vmul.f32 %v429_v28, %v253_v0 }
 0x329   : > { %431 = vst.msk [vmem:[%s252_s10] sm:$0xff] %vm254_vm0, %v430_v29 }
 0x32a   : > { %690 = shalt.err (!%p687_p10)
}
 0x32b   : > { %s691_s15 = scalar_lea.hbm %s955_s7, 128  ;;  %s695_s8 = scalar_lea.hbm %s1005_s5, 256 }
 0x32c   : > { %p692_p1 = scmp.ne.s32.totalorder %s955_s7, %s691_s15  ;;  %p696_p3 = scmp.lt.u32.totalorder %s955_s7, %s1005_s5 }
 0x32d   : > { %p697_p11 = scmp.lt.u32.totalorder %s695_s8, %s691_s15  ;;  %p699_p6 = scmp.lt.u32.totalorder %s691_s15, %s955_s7 }
 0x32e   : > { %p693_p2 = pnand %p692_p1, %p876_p8 }
 0x32f   : > { %p698_p4 = por %p697_p11, %p696_p3 }
 0x330   : > { %p694_p7 = pneg %p693_p2 }
 0x331   : > { %p700_p9 = por %p699_p6, %p698_p4 }
 0x333   : > { %p701_p12 = pnand %p700_p9, %p694_p7 }
 0x335   : > { %704 = shalt.err (!%p701_p12)
}
 0x336   : > { %562 = dma.vmem_to_hbm [thread:$0]  (%p876_p8), %s957_s6, 128, %s955_s7, %s433_s17  }
 0x337 PF: > { %s458_s9 = sand.u32 1, %s735_s18   ;;  %p1024_p13 = scmp.ne.s32.totalorder %s1010_s25, 0 }
 0x338   : > { %p1025_p0 = scmp.ge.s32.totalorder %s747_s21, 2  ;;  %s459_s10 = scalar_lea.sflag [#allocation4], %s458_s9 }
 0x33a   : > { %p573_p5 = pnand %p1025_p0, %p1024_p13 }
 0x33c   : > { %730 = dma.done.wait (!%p573_p5), %s459_s10, 128  }
 0x33d   : > { %732 = vsyncadd (!%p573_p5), %s459_s10, 4294967168  ;;  %p19_p10 = scmp.ge.s32.totalorder %s832_s29, 4   ;;  %s1026_s18 = smov %s739_s19 }
 0x33e   : > { %s1027_s19 = smov %s743_s20  ;;  %s1028_s20 = smov %s868_s27 }
 0x33f   : > { %s1029_s21 = smov %s832_s29  ;;  %21 = sbr.rel (!%p19_p10) target bundleno = 6 (0x6), region = 89 }
 0x346   :  { %464 = vsyncpa [#allocation3], 1 }
 0x347   :  { %466 = vsyncpa [#allocation3 + $0x1], 1 }
 0x348   :  { %467 = vsyncpa [#allocation6], 1 }
 0x349   :  { %468 = vsyncpa [#allocation4], 1 }
 0x34a   :  { %470 = vsyncpa [#allocation4 + $0x1], 1 }

</bundles_post_ra>
